<compile_context>
chip_gen: v5e
topology: v5e:2x2
jax: 0.10.0
libtpu: 0.0.40
codegen_flags: <defaults>
</compile_context>

<pallas_src>
import functools

import jax
import jax.numpy as jnp
from jax.experimental import pallas as pl
from jax.experimental.pallas import tpu as pltpu

SUBLANE = 8  # f32 sublane packing for the row (batch) tile


def mlp_kernel(x_ref, w1_ref, b1_ref, w2_ref, b2_ref, w3_ref, b3_ref, out_ref):
    # Per-tile f32 -> bf16 cast (VPU, hidden under the BlockSpec DMA pipeline); the wrapper
    # no longer makes a separate cast/pad HBM round trip over the batch.
    x = x_ref[...].astype(w1_ref.dtype)
    # Layer 1: Linear + ReLU (bf16 MXU inputs, f32 accumulate, f32 VPU epilogue)
    h1 = jnp.dot(x, w1_ref[...], preferred_element_type=jnp.float32)
    h1 = jnp.maximum(h1 + b1_ref[...], 0.0)
    # Layer 2: Linear + ReLU
    h2 = jnp.dot(h1.astype(w2_ref.dtype), w2_ref[...], preferred_element_type=jnp.float32)
    h2 = jnp.maximum(h2 + b2_ref[...], 0.0)
    # Output layer: Linear (no activation). Output stays un-padded (n_out is tiny): a masked
    # narrow-lane store is much cheaper than a 128-lane-padded f32 writeback + wrapper re-read.
    o = jnp.dot(h2.astype(w3_ref.dtype), w3_ref[...], preferred_element_type=jnp.float32)
    out_ref[...] = (o + b3_ref[...]).astype(out_ref.dtype)


def prepare_params(params, *, compute_dtype=jnp.bfloat16):
    """One-time glue: transpose PyTorch-convention weights to [in, out], cast MXU inputs to
    bf16, keep biases f32 as [1, N] rows. No lane padding (output path stays un-padded)."""
    w1 = params["w1"].T.astype(compute_dtype)   # [input_dim, hidden_1]
    w2 = params["w2"].T.astype(compute_dtype)   # [hidden_1, hidden_2]
    w3 = params["w3"].T.astype(compute_dtype)   # [hidden_2, n_out]
    b1 = params["b1"].reshape(1, -1).astype(jnp.float32)
    b2 = params["b2"].reshape(1, -1).astype(jnp.float32)
    b3 = params["b3"].reshape(1, -1).astype(jnp.float32)
    return {"w1": w1, "b1": b1, "w2": w2, "b2": b2, "w3": w3, "b3": b3}


@functools.partial(jax.jit, static_argnames=("tm", "min_pallas_rows"))
def classifier_mlp_forward(x, prepared, *, tm=4096, min_pallas_rows=256):
    """x: [B, input_dim] float32. prepared: output of prepare_params. Returns [B, n_out] f32."""
    w1, b1 = prepared["w1"], prepared["b1"]
    w2, b2 = prepared["w2"], prepared["b2"]
    w3, b3 = prepared["w3"], prepared["b3"]
    B, in_dim = x.shape
    n_out = w3.shape[1]

    # Small-batch fast path: pallas_call fixed overhead dominates for tiny batches.
    if B < min_pallas_rows:
        h1 = jnp.maximum(
            jnp.dot(x.astype(w1.dtype), w1, preferred_element_type=jnp.float32) + b1, 0.0)
        h2 = jnp.maximum(
            jnp.dot(h1.astype(w2.dtype), w2, preferred_element_type=jnp.float32) + b2, 0.0)
        return jnp.dot(h2.astype(w3.dtype), w3, preferred_element_type=jnp.float32) + b3

    # Row tile: as large as comfortable, but capped at ~ceil(B/2) (rounded up to the sublane
    # multiple) so the "parallel" batch axis produces >= 2 grid tiles and both v7x TensorCores
    # get work; a no-op for v5e/v6e (single TC).
    half = -(-B // 2)
    tm_cap = max(SUBLANE, ((half + SUBLANE - 1) // SUBLANE) * SUBLANE)
    tm_eff = max(SUBLANE, ((min(tm, tm_cap) + SUBLANE - 1) // SUBLANE) * SUBLANE)
    # Ragged last tile is fine: out-of-bounds rows read undefined data (rows are independent)
    # and out-of-bounds output rows are masked on store.
    n_tiles = pl.cdiv(B, tm_eff)

    def resident(a):
        # Constant index_map: weights/biases are DMA'd once and stay resident in VMEM.
        # TODO(synk): at realistic hidden dims (2k-4k) mark these pipeline_mode=pl.Buffered(1)
        # or add a K/N grid axis so double-buffered weights fit v7x's 64 MiB VMEM.
        return pl.BlockSpec(a.shape, lambda i: (0,) * a.ndim)

    # Derive the scoped VMEM limit from actual bytes (2x for pipeline double-buffering on every
    # operand + headroom for h1/h2 staging), clamped to v7x's 64 MiB physical VMEM.
    weight_bytes = sum(int(a.size) * a.dtype.itemsize for a in (w1, b1, w2, b2, w3, b3))
    io_tile_bytes = tm_eff * (in_dim * x.dtype.itemsize + n_out * 4)
    vmem_limit = int(min(max(2 * (weight_bytes + io_tile_bytes) + (8 << 20), 16 << 20), 64 << 20))

    return pl.pallas_call(
        mlp_kernel,
        out_shape=jax.ShapeDtypeStruct((B, n_out), jnp.float32),
        grid=(n_tiles,),
        in_specs=[
            pl.BlockSpec((tm_eff, in_dim), lambda i: (i, 0)),   # f32 x tile, pipelined over rows
            resident(w1), resident(b1),
            resident(w2), resident(b2),
            resident(w3), resident(b3),
        ],
        out_specs=pl.BlockSpec((tm_eff, n_out), lambda i: (i, 0)),
        compiler_params=pltpu.CompilerParams(
            dimension_semantics=("parallel",),                  # megacore-shardable on v7x
            vmem_limit_bytes=vmem_limit,
        ),
    )(x, w1, b1, w2, b2, w3, b3)


def init_params(key, input_dim, hidden_1, hidden_2, n_out):
    """Deterministic synthetic parameters (PyTorch nn.Linear shape/initialization convention)."""
    ks = jax.random.split(key, 6)

    def lin(kw, kb, fan_in, fan_out):
        bound = 1.0 / jnp.sqrt(fan_in)
        w = jax.random.uniform(kw, (fan_out, fan_in), jnp.float32, -bound, bound)
        b = jax.random.uniform(kb, (fan_out,), jnp.float32, -bound, bound)
        return w, b

    w1, b1 = lin(ks[0], ks[1], input_dim, hidden_1)
    w2, b2 = lin(ks[2], ks[3], hidden_1, hidden_2)
    w3, b3 = lin(ks[4], ks[5], hidden_2, n_out)
    return {"w1": w1, "b1": b1, "w2": w2, "b2": b2, "w3": w3, "b3": b3}


def reference_forward(x, p):
    h1 = jnp.maximum(x @ p["w1"].T + p["b1"], 0.0)
    h2 = jnp.maximum(h1 @ p["w2"].T + p["b2"], 0.0)
    return h2 @ p["w3"].T + p["b3"]


if __name__ == "__main__":
    key = jax.random.PRNGKey(0)
    k_x, k_p, k_xb = jax.random.split(key, 3)

    # Small shapes consistent with the module: batch=8, input_dim=16,
    # hidden_1=32, hidden_2=32, out (num classes)=4.
    B, input_dim, hidden_1, hidden_2, n_out = 8, 16, 32, 32, 4

    x = jax.random.normal(k_x, (B, input_dim), jnp.float32)
    params = init_params(k_p, input_dim, hidden_1, hidden_2, n_out)
    prepared = prepare_params(params)  # one-time transpose / cast (hoisted glue)

    # Force the Pallas path even at B=8 so the kernel itself is exercised.
    out = jax.block_until_ready(classifier_mlp_forward(x, prepared, min_pallas_rows=0))
    ref = reference_forward(x, params)
    assert out.shape == (B, n_out)
    # bf16 MXU inputs with f32 accumulation -> loose-ish tolerance vs pure-f32 reference.
    assert jnp.allclose(out, ref, atol=5e-2, rtol=5e-2), "mismatch vs reference"

    # Larger, ragged batch: exercises the multi-tile pipelined path (2 tiles -> v7x megacore).
    B_big = 1000
    x_big = jax.random.normal(k_xb, (B_big, input_dim), jnp.float32)
    out_big = jax.block_until_ready(classifier_mlp_forward(x_big, prepared))
    ref_big = reference_forward(x_big, params)
    assert out_big.shape == (B_big, n_out)
    assert jnp.allclose(out_big, ref_big, atol=5e-2, rtol=5e-2), "mismatch vs reference (big)"

    # Small-batch fast path (pure-XLA branch) sanity check.
    out_fast = jax.block_until_ready(classifier_mlp_forward(x, prepared))
    assert jnp.allclose(out_fast, ref, atol=5e-2, rtol=5e-2), "mismatch vs reference (fast path)"

    print("KERNEL_OK")
</pallas_src>

<mosaic_0001>
module attributes {stable_mosaic.version = 11 : i64} {
  func.func @mlp_kernel(%arg0: i32, %arg1: memref<8x16xf32, #tpu.memory_space<vmem>>, %arg2: memref<16x32xbf16, #tpu.memory_space<vmem>>, %arg3: memref<1x32xf32, #tpu.memory_space<vmem>>, %arg4: memref<32x32xbf16, #tpu.memory_space<vmem>>, %arg5: memref<1x32xf32, #tpu.memory_space<vmem>>, %arg6: memref<32x4xbf16, #tpu.memory_space<vmem>>, %arg7: memref<1x4xf32, #tpu.memory_space<vmem>>, %arg8: memref<8x4xf32, #tpu.memory_space<vmem>>) attributes {dimension_semantics = [#tpu.dimension_semantics<parallel>], iteration_bounds = array<i64: 1>, scalar_prefetch = 0 : i64, scratch_operands = 0 : i64, tpu.core_type = #tpu.core_type<tc>, window_params = [{transform_indices = @transform_0, window_bounds = array<i64: 8, 16>}, {pipeline_mode = #tpu.pipeline_mode<synchronous>, transform_indices = @transform_1, window_bounds = array<i64: 16, 32>}, {pipeline_mode = #tpu.pipeline_mode<synchronous>, transform_indices = @transform_2, window_bounds = array<i64: 1, 32>}, {pipeline_mode = #tpu.pipeline_mode<synchronous>, transform_indices = @transform_3, window_bounds = array<i64: 32, 32>}, {pipeline_mode = #tpu.pipeline_mode<synchronous>, transform_indices = @transform_4, window_bounds = array<i64: 1, 32>}, {pipeline_mode = #tpu.pipeline_mode<synchronous>, transform_indices = @transform_5, window_bounds = array<i64: 32, 4>}, {pipeline_mode = #tpu.pipeline_mode<synchronous>, transform_indices = @transform_6, window_bounds = array<i64: 1, 4>}, {transform_indices = @transform_7, window_bounds = array<i64: 8, 4>}]} {
    %c0 = arith.constant 0 : index
    %c0_0 = arith.constant 0 : index
    %0 = vector.load %arg1[%c0, %c0_0] : memref<8x16xf32, #tpu.memory_space<vmem>>, vector<8x16xf32>
    %1 = arith.truncf %0 : vector<8x16xf32> to vector<8x16xbf16>
    %c0_1 = arith.constant 0 : index
    %c0_2 = arith.constant 0 : index
    %2 = vector.load %arg2[%c0_1, %c0_2] : memref<16x32xbf16, #tpu.memory_space<vmem>>, vector<16x32xbf16>
    %cst = arith.constant dense<0.000000e+00> : vector<8x32xf32>
    %3 = tpu.matmul %1, %2, %cst {dimension_numbers = #tpu.dot_dimension_numbers<[1], [0], [0], [1], [0, 0, 1, 1], [], []>} : vector<8x16xbf16>, vector<16x32xbf16>, vector<8x32xf32> -> vector<8x32xf32>
    %c0_3 = arith.constant 0 : index
    %c0_4 = arith.constant 0 : index
    %4 = vector.load %arg3[%c0_3, %c0_4] : memref<1x32xf32, #tpu.memory_space<vmem>>, vector<1x32xf32>
    %5 = vector.broadcast %4 : vector<1x32xf32> to vector<8x32xf32>
    %6 = arith.addf %3, %5 : vector<8x32xf32>
    %cst_5 = arith.constant 0.000000e+00 : f32
    %7 = vector.broadcast %cst_5 : f32 to vector<8x32xf32>
    %8 = arith.maximumf %6, %7 : vector<8x32xf32>
    %9 = arith.truncf %8 : vector<8x32xf32> to vector<8x32xbf16>
    %c0_6 = arith.constant 0 : index
    %c0_7 = arith.constant 0 : index
    %10 = vector.load %arg4[%c0_6, %c0_7] : memref<32x32xbf16, #tpu.memory_space<vmem>>, vector<32x32xbf16>
    %cst_8 = arith.constant dense<0.000000e+00> : vector<8x32xf32>
    %11 = tpu.matmul %9, %10, %cst_8 {dimension_numbers = #tpu.dot_dimension_numbers<[1], [0], [0], [1], [0, 0, 1, 1], [], []>} : vector<8x32xbf16>, vector<32x32xbf16>, vector<8x32xf32> -> vector<8x32xf32>
    %c0_9 = arith.constant 0 : index
    %c0_10 = arith.constant 0 : index
    %12 = vector.load %arg5[%c0_9, %c0_10] : memref<1x32xf32, #tpu.memory_space<vmem>>, vector<1x32xf32>
    %13 = vector.broadcast %12 : vector<1x32xf32> to vector<8x32xf32>
    %14 = arith.addf %11, %13 : vector<8x32xf32>
    %cst_11 = arith.constant 0.000000e+00 : f32
    %15 = vector.broadcast %cst_11 : f32 to vector<8x32xf32>
    %16 = arith.maximumf %14, %15 : vector<8x32xf32>
    %17 = arith.truncf %16 : vector<8x32xf32> to vector<8x32xbf16>
    %c0_12 = arith.constant 0 : index
    %c0_13 = arith.constant 0 : index
    %18 = vector.load %arg6[%c0_12, %c0_13] : memref<32x4xbf16, #tpu.memory_space<vmem>>, vector<32x4xbf16>
    %cst_14 = arith.constant dense<0.000000e+00> : vector<8x4xf32>
    %19 = tpu.matmul %17, %18, %cst_14 {dimension_numbers = #tpu.dot_dimension_numbers<[1], [0], [0], [1], [0, 0, 1, 1], [], []>} : vector<8x32xbf16>, vector<32x4xbf16>, vector<8x4xf32> -> vector<8x4xf32>
    %c0_15 = arith.constant 0 : index
    %c0_16 = arith.constant 0 : index
    %20 = vector.load %arg7[%c0_15, %c0_16] : memref<1x4xf32, #tpu.memory_space<vmem>>, vector<1x4xf32>
    %21 = vector.broadcast %20 : vector<1x4xf32> to vector<8x4xf32>
    %22 = arith.addf %19, %21 : vector<8x4xf32>
    %c0_17 = arith.constant 0 : index
    %c0_18 = arith.constant 0 : index
    %23 = vector.load %arg8[%c0_17, %c0_18] : memref<8x4xf32, #tpu.memory_space<vmem>>, vector<8x4xf32>
    tpu.vector_store %arg8[%c0_17, %c0_18], %22 {strides = array<i32>} : memref<8x4xf32, #tpu.memory_space<vmem>>, vector<8x4xf32>,
    return
  }
  func.func @transform_0(%arg0: i32) -> (i32, i32) {
    %c0_i32 = arith.constant 0 : i32
    %c0_i32_0 = arith.constant 0 : i32
    return %arg0, %c0_i32 : i32, i32
  }
  func.func @transform_1(%arg0: i32) -> (i32, i32) {
    %c0_i32 = arith.constant 0 : i32
    %c0_i32_0 = arith.constant 0 : i32
    %c0_i32_1 = arith.constant 0 : i32
    return %c0_i32, %c0_i32_0 : i32, i32
  }
  func.func @transform_2(%arg0: i32) -> (i32, i32) {
    %c0_i32 = arith.constant 0 : i32
    %c0_i32_0 = arith.constant 0 : i32
    %c0_i32_1 = arith.constant 0 : i32
    return %c0_i32, %c0_i32_0 : i32, i32
  }
  func.func @transform_3(%arg0: i32) -> (i32, i32) {
    %c0_i32 = arith.constant 0 : i32
    %c0_i32_0 = arith.constant 0 : i32
    %c0_i32_1 = arith.constant 0 : i32
    return %c0_i32, %c0_i32_0 : i32, i32
  }
  func.func @transform_4(%arg0: i32) -> (i32, i32) {
    %c0_i32 = arith.constant 0 : i32
    %c0_i32_0 = arith.constant 0 : i32
    %c0_i32_1 = arith.constant 0 : i32
    return %c0_i32, %c0_i32_0 : i32, i32
  }
  func.func @transform_5(%arg0: i32) -> (i32, i32) {
    %c0_i32 = arith.constant 0 : i32
    %c0_i32_0 = arith.constant 0 : i32
    %c0_i32_1 = arith.constant 0 : i32
    return %c0_i32, %c0_i32_0 : i32, i32
  }
  func.func @transform_6(%arg0: i32) -> (i32, i32) {
    %c0_i32 = arith.constant 0 : i32
    %c0_i32_0 = arith.constant 0 : i32
    %c0_i32_1 = arith.constant 0 : i32
    return %c0_i32, %c0_i32_0 : i32, i32
  }
  func.func @transform_7(%arg0: i32) -> (i32, i32) {
    %c0_i32 = arith.constant 0 : i32
    %c0_i32_0 = arith.constant 0 : i32
    return %arg0, %c0_i32 : i32, i32
  }
}

</mosaic_0001>

<bundles_post_ra>
// kernel: classifier_mlp_forward.1
= control target key start
LH: loop header
LB: loop body
LE: loop exit
PB: predicated region body
PF: predicated region fallthrough
CT: control target
= control target key end

     0   :  { %12 = vsyncpa [#allocation3], 0  ;;  %s334_s0 = inlined_call_operand.hbm [shape: f32[8,16], index: 0, kind: input, shape index: {}]   ;;  %s335_s1 = inlined_call_operand.hbm [shape: bf16[16,32], index: 1, kind: input, shape index: {}]   ;;  %s336_s2 = inlined_call_operand.vmem [shape: f32[1,32], index: 2, kind: input, shape index: {}]   ;;  %s337_s3 = inlined_call_operand.vmem [shape: bf16[32,32], index: 3, kind: input, shape index: {}]   ;;  %s338_s4 = inlined_call_operand.vmem [shape: f32[1,32], index: 4, kind: input, shape index: {}]   ;;  %s339_s5 = inlined_call_operand.vmem [shape: bf16[32,4], index: 5, kind: input, shape index: {}]   ;;  %s340_s6 = inlined_call_operand.vmem [shape: f32[1,4], index: 6, kind: input, shape index: {}]   ;;  %s341_s7 = inlined_call_operand.vmem [shape: f32[8,4], index: 7, kind: output, shape index: {}]  }
   0x1   :  { %s19_s26 = sshll.u32 %s334_s0, 4  ;;  %s20_s26 = int_to_ptr.hbm [resolvable:$true] %s19_s26 }
   0x2   :  { %13 = vsyncpa [#allocation5], 0  ;;  %s260_s27 = smov [#allocation2]   ;;  %s29_s8 = sshll.u32 %s335_s1, 4  ;;  %s30_s8 = int_to_ptr.hbm [resolvable:$true] %s29_s8 }
   0x3   :  { %s21_s28 = sshll.u32 %s260_s27, 4  ;;  %s261_s9 = smov [#allocation4]   ;;  %s22_s28 = int_to_ptr.vmem [resolvable:$true] %s21_s28 }
   0x4   :  { %24 = dma.hbm_to_vmem [thread:$0]  %s20_s26, 128, %s22_s28, [#allocation3]  }
   0x5   :  { %s31_s10 = sshll.u32 %s261_s9, 4  ;;  %s262_s11 = smov 64   ;;  %s32_s10 = int_to_ptr.vmem [resolvable:$true] %s31_s10 }
   0x6   :  { %s263_s12 = smov 4  }
   0x7   :  { %37 = dma.hbm_to_vmem [thread:$0]  %s30_s8, 128, %s32_s10, [#allocation5], %s262_s11, %s262_s11, %s263_s12  }
   0x8   :  { %256 = dma.done.wait [#allocation3], 128  }
   0x9   :  { %257 = vsyncadd [#allocation3], 4294967168 }
   0xa   :  { %258 = dma.done.wait [#allocation5], 128  }
   0xb   :  { %259 = vsyncadd [#allocation5], 4294967168  ;;  %v196_v0 = vld [vmem:[#allocation4] sm:$0xff]  ;;  %v57_v1 = vld [vmem:[#allocation2] sm:$0xff]  ;;  %vm71_vm0 = vcmask 130048   ;;  %vm110_vm1 = vcmask 261120  }
   0xc   :  { %v58_v2 = vpack.c.bf16 %v57_v1, %v57_v1  ;;  %82 = vmatpush.bf16.msra.mxu0 %v196_v0  ;;  %v198_v3 = vld [vmem:[%s337_s3 + $0x8] sm:$0xff]  ;;  %v197_v4 = vld [vmem:[%s337_s3] sm:$0xff]  ;;  %vm165_vm2 = vcmask 31744  }
   0xd   :  { %120 = vmatpush.bf16.msra.mxu1 %v198_v3  ;;  %v205_v5 = vld [vmem:[%s336_s2] ss:$0 sm:$0xff]  ;;  %v200_v11 = vld [vmem:[%s339_s5 + $0x8] sm:$0xff] }
   0xe   :  { %158 = vmatpush.bf16.msra.mxu2 %v200_v11  ;;  %v199_v12 = vld [vmem:[%s339_s5] sm:$0xff] }
   0xf   :  { %177 = vmatmul.msk.bf16.vlgmr.msra.gmra.mxu0 %vm71_vm0, %v58_v2  ;;  %v206_v13 = vld [vmem:[%s338_s4] ss:$0 sm:$0xff] }
  0x10   :  { %v207_v19 = vld [vmem:[%s340_s6] ss:$0 sm:$0xff] }
  0x11   :  { %121 = vmatpush.bf16.msra.mxu1 %v197_v4 }
  0x12   :  { %159 = vmatpush.bf16.msra.mxu2 %v199_v12 }
  0x8c   :  { %v84_v6 = vpop.f32.mrf.mxu0 }
  0x8d   :  { %v85_v7 = vadd.f32 %v205_v5, %v84_v6 }
  0x8f   :  { %v88_v8 = vmax.f32 %v85_v7, 0.0 }
  0x91   :  { %v89_v9 = vpack.c.bf16 %v88_v8, %v88_v8 }
  0x93   :  { %186 = vmatmul.msk.bf16.vlgmr.msra.gmra.mxu1 %vm110_vm1, %v89_v9 }
  0x94   :  { %v86_v10 = vpop.f32.mrf.mxu0 }
 0x110   :  { %v123_v14 = vpop.f32.mrf.mxu1 }
 0x111   :  { %v124_v15 = vadd.f32 %v206_v13, %v123_v14 }
 0x113   :  { %v127_v16 = vmax.f32 %v124_v15, 0.0 }
 0x115   :  { %v128_v17 = vpack.c.bf16 %v127_v16, %v127_v16 }
 0x117   :  { %195 = vmatmul.msk.bf16.vlgmr.msra.gmra.mxu2 %vm110_vm1, %v128_v17 }
 0x118   :  { %v125_v18 = vpop.f32.mrf.mxu1 }
 0x19a   :  { %v161_v20 = vpop.f32.mrf.mxu2 }
 0x19b   :  { %v162_v21 = vadd.f32 %v207_v19, %v161_v20 }
 0x19d   :  { %166 = vst.msk [vmem:[%s341_s7] sm:$0xff] %vm165_vm2, %v162_v21 }
 0x1a2   :  { %v163_v22 = vpop.f32.mrf.mxu2 }
 0x1a3   :  { %171 = vsyncpa [#allocation3], 1 }
 0x1a4   :  { %172 = vsyncpa [#allocation5], 1 }

</bundles_post_ra>
